<compile_context>
chip_gen: v6e
topology: v6e:2x2x1
jax: 0.10.0
libtpu: 0.0.40
codegen_flags: <defaults>
</compile_context>

<pallas_src>
import functools

import jax
import jax.numpy as jnp
from jax.experimental import pallas as pl
from jax.experimental.pallas import tpu as pltpu


def _round_up(x: int, m: int) -> int:
    return ((x + m - 1) // m) * m


def _bcl_kernel(pred_ref, tgt_ref, tinv_ref, out_ref, *,
                n_rows: int, tile_n: int, mask_tail: bool):
    tile, c = pred_ref.shape

    # Native-dtype load, f32 math.
    pred = pred_ref[...].astype(jnp.float32)                       # (tile, C)

    # Numerically stable log-softmax pieces along the class (lane) axis.
    m = jnp.max(pred, axis=-1, keepdims=True)
    shifted = pred - m
    lse = jnp.log(jnp.sum(jnp.exp(shifted), axis=-1, keepdims=True))  # (tile, 1)

    # In-kernel one-hot (VPU compare) -> MXU against VMEM-resident T_inv.
    classes = jax.lax.broadcasted_iota(jnp.int32, (tile, c), 1)
    one_hot = (classes == tgt_ref[...]).astype(jnp.float32)        # (tile, C)
    # TODO(synk): for C >= ~512 (esp. v5e) run this matmul in bf16 (one_hot 0/1 is exact)
    # and store T_inv as bf16 / single-buffered to cut MXU passes and resident VMEM.
    w = jnp.dot(one_hot, tinv_ref[...], preferred_element_type=jnp.float32)  # (tile, C)

    # sum_c w*log_p == sum_c w*shifted - lse * sum_c w   (log_p never materialized)
    row = (jnp.sum(w * shifted, axis=-1, keepdims=True)
           - lse * jnp.sum(w, axis=-1, keepdims=True))              # (tile, 1)

    if mask_tail:
        # Ragged last tile: rows >= N hold undefined data; select them out (where() is a
        # select, so NaN/Inf in the unselected operand never propagates).
        rows = jax.lax.broadcasted_iota(jnp.int32, (tile, 1), 0)
        valid = (pl.program_id(0) * tile_n + rows) < n_rows
        row = jnp.where(valid, row, 0.0)

    partial = -jnp.sum(row)                                         # scalar, this tile
    # Lane-dense full-block store; wrapper reads element [i, 0, 0].
    out_ref[...] = jnp.full(out_ref.shape, partial, dtype=out_ref.dtype)


def backward_corrected_loss(pred: jax.Array, target: jax.Array, T: jax.Array,
                            *, tile_n: int | None = None) -> jax.Array:
    """pred: (N, C) float (any float dtype), target: (N,) int, T: (C, C). Scalar f32 loss."""
    n, c = pred.shape
    itemsize = jnp.dtype(pred.dtype).itemsize
    c_lanes = _round_up(c, 128)          # in-VMEM lane-padded width of a (., C) block

    # Generation-aware scoped-VMEM budget: ~48 MiB on v7x (64 MiB physical), 64 MiB on
    # v5e/v6e (128 MiB physical).
    try:
        vmem_cap = int(pltpu.get_tpu_info().vmem_capacity_bytes)
    except Exception:  # non-TPU trace / older API: fall back to the most conservative chip
        vmem_cap = 64 * 1024 * 1024
    vmem_limit = max(32 * 1024 * 1024,
                     min(vmem_cap - 16 * 1024 * 1024, 64 * 1024 * 1024))

    if tile_n is None:
        # Byte-sized tile selection (multi-hundred-KiB / MiB pred blocks), with real VMEM
        # accounting: lane-padded double-buffered pred + lane-padded int32 target buffers
        # + f32 temporaries + resident (double-buffered) f32 T_inv.
        fixed = 2 * _round_up(c, 8) * c_lanes * 4
        per_row = (2 * c_lanes * itemsize       # pred block, 2 pipeline buffers
                   + 2 * 128 * 4                # (tile,1) int32 target, lane-padded, 2 buffers
                   + 6 * c_lanes * 4)           # f32 temporaries (shifted/exp/one_hot/w/...)
        rows = (int(vmem_limit * 0.6) - fixed) // per_row
        tile_n = int(max(8, min(rows, 16384)))
        # TODO(synk): for very large C (fixed ~ vmem_limit) T_inv itself should be tiled
        # along its rows and/or stored bf16 single-buffered.

    if tile_n >= n:
        tile_n = n                         # one block; full-dim block is always legal
    else:
        tile_n = max(8, (tile_n // 8) * 8)
    num_tiles = (n + tile_n - 1) // tile_n
    mask_tail = (n % tile_n) != 0

    # Setup glue (not the hot path): inverse of the C x C noise matrix; target as (N, 1).
    t_inv = jnp.linalg.inv(T.astype(jnp.float32))
    tgt = target.astype(jnp.int32).reshape(-1, 1)

    cost = pl.CostEstimate(
        flops=int(2 * n * c * c + 6 * n * c),
        transcendentals=int(n * c + n),
        bytes_accessed=int(n * c * itemsize + n * 4 + c * c * 4
                           + num_tiles * 8 * 128 * 4),
    )

    partials = pl.pallas_call(
        functools.partial(_bcl_kernel, n_rows=n, tile_n=tile_n, mask_tail=mask_tail),
        out_shape=jax.ShapeDtypeStruct((num_tiles, 8, 128), jnp.float32),
        grid_spec=pltpu.PrefetchScalarGridSpec(
            num_scalar_prefetch=0,
            grid=(num_tiles,),
            in_specs=[
                pl.BlockSpec((tile_n, c), lambda i: (i, 0)),   # pred: native dtype, no padding
                pl.BlockSpec((tile_n, 1), lambda i: (i, 0)),   # target (int32)
                pl.BlockSpec((c, c), lambda i: (0, 0)),        # T_inv, VMEM-resident
            ],
            out_specs=pl.BlockSpec((1, 8, 128), lambda i: (i, 0, 0)),  # per-tile partial
        ),
        compiler_params=pltpu.CompilerParams(
            dimension_semantics=("parallel",),   # independent tiles -> v7x megacore can split
            vmem_limit_bytes=int(vmem_limit),
        ),
        cost_estimate=cost,
    )(pred, tgt, t_inv)

    # Sum the per-tile partials outside the kernel (f32, better numerics than a running RMW).
    return jnp.sum(partials[:, 0, 0])


def _reference(pred, target, T):
    t_inv = jnp.linalg.inv(T.astype(jnp.float32))
    one_hot = jax.nn.one_hot(target, pred.shape[-1], dtype=jnp.float32)
    log_p = jax.nn.log_softmax(pred.astype(jnp.float32), axis=1)
    return -jnp.sum((one_hot @ t_inv) * log_p)


def _make_T(c, eps=0.3):
    return (1.0 - eps) * jnp.eye(c, dtype=jnp.float32) + (eps / (c - 1)) * (
        jnp.ones((c, c), dtype=jnp.float32) - jnp.eye(c, dtype=jnp.float32)
    )


if __name__ == "__main__":
    key = jax.random.PRNGKey(0)

    # --- Test 1: small shape matching the module spec (single exact tile, f32). ---
    k1, k2, key = jax.random.split(key, 3)
    N, C = 8, 4
    pred = jax.random.normal(k1, (N, C), dtype=jnp.float32)
    target = jax.random.randint(k2, (N,), 0, C, dtype=jnp.int32)
    T = _make_T(C)

    loss = backward_corrected_loss(pred, target, T)
    jax.block_until_ready(loss)
    ref = _reference(pred, target, T)
    assert jnp.allclose(loss, ref, rtol=1e-4, atol=1e-4), (loss, ref)

    # --- Test 2: multi-tile ragged grid (N=20, tile_n=8 -> 3 tiles, masked tail), bf16 pred. ---
    k3, k4, key = jax.random.split(key, 3)
    N2, C2 = 20, 10
    pred2 = jax.random.normal(k3, (N2, C2), dtype=jnp.float32).astype(jnp.bfloat16)
    target2 = jax.random.randint(k4, (N2,), 0, C2, dtype=jnp.int32)
    T2 = _make_T(C2)

    loss2 = backward_corrected_loss(pred2, target2, T2, tile_n=8)
    jax.block_until_ready(loss2)
    ref2 = _reference(pred2, target2, T2)
    assert jnp.allclose(loss2, ref2, rtol=1e-4, atol=1e-4), (loss2, ref2)

    print("KERNEL_OK")
</pallas_src>

<mosaic_0001>
module attributes {stable_mosaic.version = 11 : i64} {
  func.func @_bcl_kernel(%arg0: i32, %arg1: memref<8x4xf32, #tpu.memory_space<vmem>>, %arg2: memref<8x1xi32, #tpu.memory_space<vmem>>, %arg3: memref<4x4xf32, #tpu.memory_space<vmem>>, %arg4: memref<1x8x128xf32, #tpu.memory_space<vmem>>) attributes {dimension_semantics = [#tpu.dimension_semantics<parallel>], iteration_bounds = array<i64: 1>, scalar_prefetch = 0 : i64, scratch_operands = 0 : i64, tpu.core_type = #tpu.core_type<tc>, window_params = [{transform_indices = @transform_0, window_bounds = array<i64: 8, 4>}, {transform_indices = @transform_1, window_bounds = array<i64: 8, 1>}, {pipeline_mode = #tpu.pipeline_mode<synchronous>, transform_indices = @transform_2, window_bounds = array<i64: 4, 4>}, {transform_indices = @transform_3, window_bounds = array<i64: 1, 8, 128>}]} {
    %c0 = arith.constant 0 : index
    %c0_0 = arith.constant 0 : index
    %0 = vector.load %arg1[%c0, %c0_0] : memref<8x4xf32, #tpu.memory_space<vmem>>, vector<8x4xf32>
    %cst = arith.constant dense<0xFF800000> : vector<8xf32>
    %1 = vector.multi_reduction <maximumf>, %0, %cst [1] : vector<8x4xf32> to vector<8xf32>
    %2 = vector.shape_cast %1 : vector<8xf32> to vector<8x1xf32>
    %3 = vector.broadcast %2 : vector<8x1xf32> to vector<8x4xf32>
    %4 = arith.subf %0, %3 : vector<8x4xf32>
    %5 = math.exp %4 : vector<8x4xf32>
    %cst_1 = arith.constant dense<0.000000e+00> : vector<8xf32>
    %6 = vector.multi_reduction <add>, %5, %cst_1 [1] : vector<8x4xf32> to vector<8xf32>
    %7 = vector.shape_cast %6 : vector<8xf32> to vector<8x1xf32>
    %8 = math.log %7 : vector<8x1xf32>
    %9 = tpu.iota {dimensions = array<i32: 1>} : vector<8x4xi32>
    %c0_2 = arith.constant 0 : index
    %c0_3 = arith.constant 0 : index
    %10 = vector.load %arg2[%c0_2, %c0_3] : memref<8x1xi32, #tpu.memory_space<vmem>>, vector<8x1xi32>
    %11 = vector.broadcast %10 : vector<8x1xi32> to vector<8x4xi32>
    %12 = arith.cmpi eq, %9, %11 : vector<8x4xi32>
    %13 = arith.extui %12 : vector<8x4xi1> to vector<8x4xi32>
    %14 = arith.sitofp %13 : vector<8x4xi32> to vector<8x4xf32>
    %c0_4 = arith.constant 0 : index
    %c0_5 = arith.constant 0 : index
    %15 = vector.load %arg3[%c0_4, %c0_5] : memref<4x4xf32, #tpu.memory_space<vmem>>, vector<4x4xf32>
    %cst_6 = arith.constant dense<0.000000e+00> : vector<8x4xf32>
    %16 = tpu.matmul %14, %15, %cst_6 {dimension_numbers = #tpu.dot_dimension_numbers<[1], [0], [0], [1], [0, 0, 1, 1], [], []>} : vector<8x4xf32>, vector<4x4xf32>, vector<8x4xf32> -> vector<8x4xf32>
    %17 = arith.mulf %16, %4 : vector<8x4xf32>
    %cst_7 = arith.constant dense<0.000000e+00> : vector<8xf32>
    %18 = vector.multi_reduction <add>, %17, %cst_7 [1] : vector<8x4xf32> to vector<8xf32>
    %19 = vector.shape_cast %18 : vector<8xf32> to vector<8x1xf32>
    %cst_8 = arith.constant dense<0.000000e+00> : vector<8xf32>
    %20 = vector.multi_reduction <add>, %16, %cst_8 [1] : vector<8x4xf32> to vector<8xf32>
    %21 = vector.shape_cast %20 : vector<8xf32> to vector<8x1xf32>
    %22 = arith.mulf %8, %21 : vector<8x1xf32>
    %23 = arith.subf %19, %22 : vector<8x1xf32>
    %24 = vector.shape_cast %23 : vector<8x1xf32> to vector<1x8x1xf32>
    %cst_9 = arith.constant dense<0.000000e+00> : vector<1xf32>
    %25 = vector.multi_reduction <add>, %24, %cst_9 [1, 2] : vector<1x8x1xf32> to vector<1xf32>
    %26 = vector.shape_cast %25 : vector<1xf32> to vector<1x1x1xf32>
    %27 = vector.extract %26[0, 0, 0] : f32 from vector<1x1x1xf32>
    %cst_10 = arith.constant 0.000000e+00 : f32
    %28 = arith.subf %cst_10, %27 : f32
    %29 = vector.broadcast %28 : f32 to vector<1x8x128xf32>
    %c0_11 = arith.constant 0 : index
    %c0_12 = arith.constant 0 : index
    %c0_13 = arith.constant 0 : index
    %30 = vector.load %arg4[%c0_11, %c0_12, %c0_13] : memref<1x8x128xf32, #tpu.memory_space<vmem>>, vector<1x8x128xf32>
    tpu.vector_store %arg4[%c0_11, %c0_12, %c0_13], %29 {strides = array<i32>} : memref<1x8x128xf32, #tpu.memory_space<vmem>>, vector<1x8x128xf32>,
    return
  }
  func.func @transform_0(%arg0: i32) -> (i32, i32) {
    %c0_i32 = arith.constant 0 : i32
    %c0_i32_0 = arith.constant 0 : i32
    return %arg0, %c0_i32 : i32, i32
  }
  func.func @transform_1(%arg0: i32) -> (i32, i32) {
    %c0_i32 = arith.constant 0 : i32
    %c0_i32_0 = arith.constant 0 : i32
    return %arg0, %c0_i32 : i32, i32
  }
  func.func @transform_2(%arg0: i32) -> (i32, i32) {
    %c0_i32 = arith.constant 0 : i32
    %c0_i32_0 = arith.constant 0 : i32
    %c0_i32_1 = arith.constant 0 : i32
    return %c0_i32, %c0_i32_0 : i32, i32
  }
  func.func @transform_3(%arg0: i32) -> (i32, i32, i32) {
    %c0_i32 = arith.constant 0 : i32
    %c0_i32_0 = arith.constant 0 : i32
    %c0_i32_1 = arith.constant 0 : i32
    return %arg0, %c0_i32, %c0_i32_0 : i32, i32, i32
  }
}

</mosaic_0001>

<bundles_post_ra>
// kernel: tpu_custom_call.1
= control target key start
LH: loop header
LB: loop body
LE: loop exit
PB: predicated region body
PF: predicated region fallthrough
CT: control target
= control target key end

     0   :  { %vm41_vm0 = vcmask 1043456   ;;  %v195_v2 = vmov 0   ;;  %v196_v3 = vmov 0.0   ;;  %s236_s0 = inlined_call_operand.vmem [shape: f32[8,4], index: 0, kind: input, shape index: {}]   ;;  %s237_s1 = inlined_call_operand.vmem [shape: s32[8,1], index: 1, kind: input, shape index: {}]   ;;  %s238_s2 = inlined_call_operand.vmem [shape: f32[4,4], index: 2, kind: input, shape index: {}]   ;;  %s239_s3 = inlined_call_operand.hbm [shape: f32[1,8,128], index: 3, kind: output, shape index: {}]  }
   0x1   :  { %v30_v0 = vld [vmem:[%s237_s1] sm:$0xff]  ;;  %168 = vset.pattern.permute.xlu0 %v195_v2  ;;  %157 = vmatprep.subr.mxu0 %v196_v3 }
   0x2   :  { %v37_v1 = vld [vmem:[%s238_s2] sm:$0xf] }
   0x3   :  { %8 = vsyncpa [#allocation3], 0  ;;  %32 = vperm.xlu0 %168, %v30_v0   ;;  %158 = vmatpush3.msk.msra.mxu0 %vm41_vm0, %v37_v1  ;;  %vm197_vm1 = vmmov 0   ;;  %v15_v4 = vld [vmem:[%s236_s0] sm:$0xff]  ;;  %vm16_vm2 = vcmask 31744   ;;  %v28_v6 = vlaneseq  ;;  %vm124_vm4 = vcmask 7168  }
   0x4   :  { %159 = vmatprep.mubr.msk.f32.mxu0 %vm197_vm1, %v196_v3  ;;  %v17_v5 = vsel %vm16_vm2, %v15_v4, -inf  ;;  %s198_s0 = smov [#allocation2]  }
   0x5   :  { %v29_v7 = vand.u32 127, %v28_v6  ;;  %s144_s1 = sshll.u32 %s198_s0, 4  ;;  %s145_s1 = int_to_ptr.vmem [resolvable:$true] %s144_s1 }
   0x6   :  { %s173_s19 = scalar_lea.vmem %s145_s1, 128  ;;  %p178_p1 = scmp.lt.s32.totalorder %s145_s1, %s145_s1 }
   0x7   :  { %p174_p0 = scmp.ne.s32.totalorder %s145_s1, %s173_s19  ;;  %p179_p2 = scmp.lt.s32.totalorder %s173_s19, %s173_s19 }
   0x9   :  { %p180_p3 = por %p179_p2, %p178_p1 }
   0xb   :  { %p181_p4 = pnand %p180_p3, %p174_p0 }
  0x22   :  { %18 = vmax.xlane.f32.xlu0 %v17_v5 }
  0x7e   :  { %v33_v8 = vpop.permute.xlu0 %32 }
  0x7f   :  { %vm34_vm3 = vcmp.eq.s32.totalorder %v29_v7, %v33_v8 }
  0x80   :  { %v152_v9 = vsel %vm34_vm3, 1.0, %v196_v3 }
  0x81   :  { %160 = vmatmul.mubr.msk.f32.vlgmr.msra.gmra.mxu0 %vm16_vm2, %v152_v9 }
  0xab   :  { %v19_v10 = vpop.xlane.xlu0 %18 }
  0xac   :  { %v20_v11 = vsub.f32 %v15_v4, %v19_v10 }
  0xae   :  { %v21_v12 = vmul.f32 1.442695, %v20_v11 }
  0xb0   :  { %169 = vpow2.f32 %v21_v12 }
  0xbd   :  { %v170_v13 = vpop.eup %169 }
  0xbe   :  { %v23_v14 = vsel %vm16_vm2, %v170_v13, 0.0 }
  0xbf   :  { %24 = vadd.xlane.f32.xlu1 %v23_v14 }
 0x141   :  { %v111_v15 = vpop.f32.mrf.mxu0 }
 0x142   :  { %v115_v16 = vmul.f32 %v111_v15, %v20_v11  ;;  %v119_v17 = vsel %vm16_vm2, %v111_v15, 0.0 }
 0x143   :  { %v161_v18 = vpop.f32.mrf.mxu0  ;;  %120 = vadd.xlane.f32.xlu1 %v119_v17 }
 0x144   :  { %v116_v19 = vsel %vm16_vm2, %v115_v16, 0.0 }
 0x147   :  { %117 = vadd.xlane.f32.xlu1 %v116_v19 }
 0x148   :  { %v25_v20 = vpop.xlane.xlu1 %24 }
 0x149   :  { %171 = vlog2.f32 %v25_v20 }
 0x156   :  { %v172_v21 = vpop.eup %171 }
 0x157   :  { %v27_v22 = vmul.f32 0.6931472, %v172_v21 }
 0x1cc   :  { %v121_v23 = vpop.xlane.xlu1 %120 }
 0x1cd   :  { %v122_v24 = vmul.f32 %v121_v23, %v27_v22 }
 0x1d0   :  { %v118_v25 = vpop.xlane.xlu1 %117 }
 0x1d1   :  { %v123_v26 = vsub.f32 %v118_v25, %v122_v24 }
 0x1d3   :  { %v125_v27 = vsel %vm124_vm4, %v123_v26, 0.0 }
 0x1d4   :  { %126 = vadd.xlane.f32.xlu1 %v125_v27 }
 0x25d   :  { %v127_v28 = vpop.xlane.xlu1 %126 }
 0x25e   :  { %v128_v29 = vrot.slane %v127_v28, 4 }
 0x260   :  { %v129_v30 = vadd.f32 %v128_v29, %v127_v28 }
 0x262   :  { %v130_v31 = vrot.slane %v129_v30, 2 }
 0x264   :  { %v131_v32 = vadd.f32 %v130_v31, %v129_v30 }
 0x266   :  { %v132_v33 = vrot.slane %v131_v32, 1 }
 0x268   :  { %v133_v34 = vadd.f32 %v132_v33, %v131_v32 }
 0x26a   :  { %162 = vpush %v133_v34 }
 0x29b   :  { %s163_s2 = spop %162 }
 0x29c   :  { %s135_s18 = ssub.f32 0.0, %s163_s2 }
 0x29e   :  { %v136_v35 = vstv %s135_s18 }
 0x29f   :  { %137 = vst [vmem:[#allocation2] sm:$0xff] %v136_v35 }
 0x2a0   :  { %184 = shalt.err (!%p181_p4)
}
 0x2a1   :  { %147 = dma.vmem_to_hbm [thread:$0]  %s145_s1, 128, %s239_s3, [#allocation3]  }
 0x2a2   :  { %193 = dma.done.wait [#allocation3], 128  }
 0x2a3   :  { %194 = vsyncadd [#allocation3], 4294967168 }
 0x2a4   :  { %151 = vsyncpa [#allocation3], 1 }

</bundles_post_ra>
